<compile_context>
chip_gen: v7x
topology: tpu7x:2x2x1
jax: 0.10.0
libtpu: 0.0.40
codegen_flags: <defaults>
</compile_context>

<pallas_src>
import functools

import jax
import jax.numpy as jnp
from jax.experimental import pallas as pl
from jax.experimental.pallas import tpu as pltpu  # noqa: F401  (TPU backend)


def _identity_copy_kernel(x_ref, o_ref):
    # Whole-block identity copy (VMEM -> VMEM); Pallas handles HBM<->VMEM DMA.
    o_ref[...] = x_ref[...]


@jax.jit
def objective_forward(x):
    """Identity forward pass (concrete realization of the abstract Objective).

    Returns a tensor of identical shape, dtype and values.  Implemented as a
    single-block, lane-dense Pallas copy kernel: one HBM read + one HBM write
    of the tensor, no masked partial stores, no wrapper-side padding.
    """
    orig_shape = x.shape
    n = x.size
    if n % 128 == 0:
        # Lane-dense view: last dim exactly 128 -> full-width unmasked stores.
        view = (n // 128, 128)
    else:
        # Fallback: full-array single block (always satisfies the block rule).
        view = (1, n)
    x2 = x.reshape(view)

    y2 = pl.pallas_call(
        _identity_copy_kernel,
        out_shape=jax.ShapeDtypeStruct(view, x.dtype),
        grid=(1,),
        in_specs=[pl.BlockSpec(view, lambda i: (0, 0))],
        out_specs=pl.BlockSpec(view, lambda i: (0, 0)),
        cost_estimate=pl.CostEstimate(
            flops=0,
            transcendentals=0,
            bytes_accessed=2 * n * x.dtype.itemsize,
        ),
    )(x2)
    return y2.reshape(orig_shape)


if __name__ == "__main__":
    key = jax.random.PRNGKey(0)
    # Small NCHW input consistent with a typical Objective subclass input.
    x = jax.random.normal(key, (2, 4, 16, 16), dtype=jnp.float32)

    y = objective_forward(x)
    jax.block_until_ready(y)

    # Identity semantics check.
    assert y.shape == x.shape and y.dtype == x.dtype
    assert bool(jnp.allclose(y, x)), "identity forward mismatch"

    print("KERNEL_OK")
</pallas_src>

<mosaic_0001>
module attributes {stable_mosaic.version = 11 : i64} {
  func.func @_identity_copy_kernel(%arg0: i32, %arg1: memref<16x128xf32, #tpu.memory_space<vmem>>, %arg2: memref<16x128xf32, #tpu.memory_space<vmem>>) attributes {dimension_semantics = [#tpu.dimension_semantics<arbitrary>], iteration_bounds = array<i64: 1>, scalar_prefetch = 0 : i64, scratch_operands = 0 : i64, tpu.core_type = #tpu.core_type<tc>, window_params = [{pipeline_mode = #tpu.pipeline_mode<synchronous>, transform_indices = @transform_0, window_bounds = array<i64: 16, 128>}, {pipeline_mode = #tpu.pipeline_mode<synchronous>, transform_indices = @transform_1, window_bounds = array<i64: 16, 128>}]} {
    %c0 = arith.constant 0 : index
    %c0_0 = arith.constant 0 : index
    %0 = vector.load %arg1[%c0, %c0_0] : memref<16x128xf32, #tpu.memory_space<vmem>>, vector<16x128xf32>
    %c0_1 = arith.constant 0 : index
    %c0_2 = arith.constant 0 : index
    %1 = vector.load %arg2[%c0_1, %c0_2] : memref<16x128xf32, #tpu.memory_space<vmem>>, vector<16x128xf32>
    tpu.vector_store %arg2[%c0_1, %c0_2], %0 {strides = array<i32>} : memref<16x128xf32, #tpu.memory_space<vmem>>, vector<16x128xf32>,
    return
  }
  func.func @transform_0(%arg0: i32) -> (i32, i32) {
    %c0_i32 = arith.constant 0 : i32
    %c0_i32_0 = arith.constant 0 : i32
    %c0_i32_1 = arith.constant 0 : i32
    return %c0_i32, %c0_i32_0 : i32, i32
  }
  func.func @transform_1(%arg0: i32) -> (i32, i32) {
    %c0_i32 = arith.constant 0 : i32
    %c0_i32_0 = arith.constant 0 : i32
    %c0_i32_1 = arith.constant 0 : i32
    return %c0_i32, %c0_i32_0 : i32, i32
  }
}

</mosaic_0001>

<bundles_post_ra>
// kernel: objective_forward.1
= control target key start
LH: loop header
LB: loop body
LE: loop exit
PB: predicated region body
PF: predicated region fallthrough
CT: control target
= control target key end

     0   :  { %s38_s0 = inlined_call_operand.vmem [shape: f32[16,128], index: 0, kind: input, shape index: {}]   ;;  %s39_s1 = inlined_call_operand.vmem [shape: f32[16,128], index: 1, kind: output, shape index: {}]  }
   0x1   :  { %v8_v0 = vld [vmem:[%s38_s0] sm:$0xff]  ;;  %v9_v1 = vld [vmem:[%s38_s0 + $0x8] sm:$0xff] }
   0x2   :  { %10 = vst [vmem:[%s39_s1] sm:$0xff] %v8_v0  ;;  %11 = vst [vmem:[%s39_s1 + $0x8] sm:$0xff] %v9_v1 }

</bundles_post_ra>
